<compile_context>
chip_gen: v7x
topology: tpu7x:2x2x1
jax: 0.10.0
libtpu: 0.0.40
codegen_flags: <defaults>
</compile_context>

<pallas_src>
import functools

import jax
import jax.numpy as jnp
from jax.experimental import pallas as pl
from jax.experimental.pallas import tpu as pltpu


def _channel_attention_kernel(x_ref, w1t_ref, w2t_ref, o_ref, *, hw_true):
    # x_ref  : (Bt, C, HWp) block for the current batch chunk (native dtype)
    # w1t_ref: (C, hidden)  == w1.T   (nn.Linear(C, hidden, bias=False))
    # w2t_ref: (hidden, C)  == w2.T   (nn.Linear(hidden, C, bias=False))
    # o_ref  : (Bt, C, HWp)
    x = x_ref[...]                                    # keep native dtype
    bt, c, hwp = x.shape

    if hwp != hw_true:
        # Spatial axis was lane-padded: mask the pad out of the reductions.
        lane = jax.lax.broadcasted_iota(jnp.int32, (1, 1, hwp), 2)
        valid = lane < hw_true
        neg = jnp.asarray(jnp.finfo(x.dtype).min, dtype=x.dtype)
        x_max_in = jnp.where(valid, x, neg)
        x_sum_in = jnp.where(valid, x, jnp.zeros((), x.dtype))
    else:
        x_max_in = x
        x_sum_in = x

    # AdaptiveMaxPool2d(1) / AdaptiveAvgPool2d(1) over the spatial (lane) axis.
    mx = jnp.max(x_max_in, axis=2).astype(jnp.float32)                    # (Bt, C)
    av = jnp.sum(x_sum_in, axis=2, dtype=jnp.float32) * (1.0 / hw_true)   # (Bt, C)

    w1t = w1t_ref[...].astype(jnp.float32)            # (C, hidden)
    w2t = w2t_ref[...].astype(jnp.float32)            # (hidden, C)

    # Fused shared MLP: one matmul for both pooled branches (max rows stacked
    # on top of avg rows), then one matmul for the summed hidden activations.
    pooled = jnp.concatenate([mx, av], axis=0)        # (2*Bt, C)
    h = jnp.maximum(
        jnp.dot(pooled, w1t, preferred_element_type=jnp.float32), 0.0)    # (2*Bt, hidden)
    logits = jnp.dot(h[:bt] + h[bt:], w2t,
                     preferred_element_type=jnp.float32)                  # (Bt, C)
    scale = jax.nn.sigmoid(logits).astype(x.dtype)    # (Bt, C), native dtype

    # Store-bound epilogue: multiply in the native dtype, broadcast over lanes.
    o_ref[...] = (x * scale[:, :, None]).astype(o_ref.dtype)


def channel_attention(x, w1, w2, *, target_block_bytes=4 * 1024 * 1024):
    """x: (B, C, H, W). w1: (C//ratio, C), w2: (C, C//ratio), both bias-free."""
    b, c, h, w = x.shape
    hw = h * w
    hidden = w1.shape[0]

    # Lane-dense layout: pad the spatial axis up to a multiple of 128.
    hwp = pl.cdiv(hw, 128) * 128
    x3 = x.reshape(b, c, hw)
    if hwp != hw:
        x3 = jnp.pad(x3, ((0, 0), (0, 0), (0, hwp - hw)))

    # Batch elements per grid step: aim for ~target_block_bytes per input
    # block, Bt must divide B, and keep >= 2 grid programs when B >= 2 so
    # both v7x TensorCores get work under dimension_semantics=('parallel',).
    bytes_per_batch = c * hwp * x.dtype.itemsize
    bt_cap = max(1, target_block_bytes // max(1, bytes_per_batch))
    if b >= 2:
        bt_cap = min(bt_cap, b // 2)
    bt = 1
    for d in range(1, b + 1):
        if b % d == 0 and d <= bt_cap:
            bt = d
    grid = (b // bt,)

    # VMEM budget: double-buffered input + output blocks, weights, headroom.
    block_bytes = bt * c * hwp * x.dtype.itemsize
    weight_bytes = (w1.size + w2.size) * w1.dtype.itemsize
    vmem_limit = int(min(64 * 1024 * 1024,
                         max(32 * 1024 * 1024,
                             4 * block_bytes + 4 * weight_bytes
                             + 4 * 1024 * 1024)))

    kernel = functools.partial(_channel_attention_kernel, hw_true=hw)

    out = pl.pallas_call(
        kernel,
        out_shape=jax.ShapeDtypeStruct((b, c, hwp), x.dtype),
        grid_spec=pltpu.PrefetchScalarGridSpec(
            num_scalar_prefetch=0,
            grid=grid,
            in_specs=[
                pl.BlockSpec((bt, c, hwp), lambda i: (i, 0, 0)),
                pl.BlockSpec((c, hidden), lambda i: (0, 0)),
                pl.BlockSpec((hidden, c), lambda i: (0, 0)),
            ],
            out_specs=pl.BlockSpec((bt, c, hwp), lambda i: (i, 0, 0)),
        ),
        compiler_params=pltpu.CompilerParams(
            dimension_semantics=("parallel",),
            vmem_limit_bytes=vmem_limit),
    )(x3, w1.T, w2.T)

    if hwp != hw:
        out = out[:, :, :hw]
    return out.reshape(b, c, h, w)


def _reference(x, w1, w2):
    # Pure-JAX reference mirroring the PyTorch forward.
    max_pool = jnp.max(x, axis=(2, 3))            # (B, C)
    avg_pool = jnp.mean(x, axis=(2, 3))           # (B, C)

    def fc(v):
        return jnp.maximum(v @ w1.T, 0.0) @ w2.T

    out = jax.nn.sigmoid(fc(max_pool) + fc(avg_pool))  # (B, C)
    return x * out[:, :, None, None]


if __name__ == "__main__":
    key = jax.random.PRNGKey(0)
    k_x, k_w1, k_w2 = jax.random.split(key, 3)

    B, C, H, W = 2, 64, 16, 16   # C must be >= ratio (16) so hidden >= 1
    ratio = 16
    hidden = C // ratio

    x = jax.random.normal(k_x, (B, C, H, W), dtype=jnp.float32)
    # Deterministic synthetic weights (nn.Linear(bias=False) shapes).
    w1 = jax.random.normal(k_w1, (hidden, C), dtype=jnp.float32) * 0.1
    w2 = jax.random.normal(k_w2, (C, hidden), dtype=jnp.float32) * 0.1

    y = channel_attention(x, w1, w2)
    jax.block_until_ready(y)

    y_ref = _reference(x, w1, w2)
    assert jnp.allclose(y, y_ref, atol=1e-5, rtol=1e-5), "mismatch vs reference"

    print("KERNEL_OK")
</pallas_src>

<mosaic_0001>
module attributes {stable_mosaic.version = 11 : i64} {
  func.func @_channel_attention_kernel(%arg0: i32, %arg1: memref<1x64x256xf32, #tpu.memory_space<vmem>>, %arg2: memref<64x4xf32, #tpu.memory_space<vmem>>, %arg3: memref<4x64xf32, #tpu.memory_space<vmem>>, %arg4: memref<1x64x256xf32, #tpu.memory_space<vmem>>) attributes {dimension_semantics = [#tpu.dimension_semantics<parallel>], iteration_bounds = array<i64: 2>, scalar_prefetch = 0 : i64, scratch_operands = 0 : i64, tpu.core_type = #tpu.core_type<tc>, window_params = [{transform_indices = @transform_0, window_bounds = array<i64: 1, 64, 256>}, {pipeline_mode = #tpu.pipeline_mode<synchronous>, transform_indices = @transform_1, window_bounds = array<i64: 64, 4>}, {pipeline_mode = #tpu.pipeline_mode<synchronous>, transform_indices = @transform_2, window_bounds = array<i64: 4, 64>}, {transform_indices = @transform_3, window_bounds = array<i64: 1, 64, 256>}]} {
    %c0 = arith.constant 0 : index
    %c0_0 = arith.constant 0 : index
    %c0_1 = arith.constant 0 : index
    %0 = vector.load %arg1[%c0, %c0_0, %c0_1] : memref<1x64x256xf32, #tpu.memory_space<vmem>>, vector<1x64x256xf32>
    %cst = arith.constant dense<0xFF800000> : vector<1x64xf32>
    %1 = vector.multi_reduction <maximumf>, %0, %cst [2] : vector<1x64x256xf32> to vector<1x64xf32>
    %cst_2 = arith.constant dense<0.000000e+00> : vector<1x64xf32>
    %2 = vector.multi_reduction <add>, %0, %cst_2 [2] : vector<1x64x256xf32> to vector<1x64xf32>
    %cst_3 = arith.constant 3.906250e-03 : f32
    %3 = vector.broadcast %cst_3 : f32 to vector<1x64xf32>
    %4 = arith.mulf %2, %3 : vector<1x64xf32>
    %c0_4 = arith.constant 0 : index
    %c0_5 = arith.constant 0 : index
    %5 = vector.load %arg2[%c0_4, %c0_5] : memref<64x4xf32, #tpu.memory_space<vmem>>, vector<64x4xf32>
    %c0_6 = arith.constant 0 : index
    %c0_7 = arith.constant 0 : index
    %6 = vector.load %arg3[%c0_6, %c0_7] : memref<4x64xf32, #tpu.memory_space<vmem>>, vector<4x64xf32>
    %7 = tpu.concatenate %1, %4 in 0 : vector<1x64xf32>, vector<1x64xf32> -> vector<2x64xf32>
    %cst_8 = arith.constant dense<0.000000e+00> : vector<2x4xf32>
    %8 = tpu.matmul %7, %5, %cst_8 {dimension_numbers = #tpu.dot_dimension_numbers<[1], [0], [0], [1], [0, 0, 1, 1], [], []>} : vector<2x64xf32>, vector<64x4xf32>, vector<2x4xf32> -> vector<2x4xf32>
    %cst_9 = arith.constant 0.000000e+00 : f32
    %9 = vector.broadcast %cst_9 : f32 to vector<2x4xf32>
    %10 = arith.maximumf %8, %9 : vector<2x4xf32>
    %11 = vector.extract_strided_slice %10 {offsets = [0, 0], sizes = [1, 4], strides = [1, 1]} : vector<2x4xf32> to vector<1x4xf32>
    %12 = vector.extract_strided_slice %10 {offsets = [1, 0], sizes = [1, 4], strides = [1, 1]} : vector<2x4xf32> to vector<1x4xf32>
    %13 = arith.addf %11, %12 : vector<1x4xf32>
    %cst_10 = arith.constant dense<0.000000e+00> : vector<1x64xf32>
    %14 = tpu.matmul %13, %6, %cst_10 {dimension_numbers = #tpu.dot_dimension_numbers<[1], [0], [0], [1], [0, 0, 1, 1], [], []>} : vector<1x4xf32>, vector<4x64xf32>, vector<1x64xf32> -> vector<1x64xf32>
    %15 = arith.negf %14 : vector<1x64xf32>
    %16 = math.exp %15 : vector<1x64xf32>
    %cst_11 = arith.constant 1.000000e+00 : f32
    %17 = vector.broadcast %cst_11 : f32 to vector<1x64xf32>
    %18 = arith.addf %17, %16 : vector<1x64xf32>
    %19 = arith.divf %17, %18 : vector<1x64xf32>
    %20 = vector.shape_cast %19 : vector<1x64xf32> to vector<1x64x1xf32>
    %21 = vector.broadcast %20 : vector<1x64x1xf32> to vector<1x64x256xf32>
    %22 = arith.mulf %0, %21 : vector<1x64x256xf32>
    %c0_12 = arith.constant 0 : index
    %c0_13 = arith.constant 0 : index
    %c0_14 = arith.constant 0 : index
    %23 = vector.load %arg4[%c0_12, %c0_13, %c0_14] : memref<1x64x256xf32, #tpu.memory_space<vmem>>, vector<1x64x256xf32>
    tpu.vector_store %arg4[%c0_12, %c0_13, %c0_14], %22 {strides = array<i32>} : memref<1x64x256xf32, #tpu.memory_space<vmem>>, vector<1x64x256xf32>,
    return
  }
  func.func @transform_0(%arg0: i32) -> (i32, i32, i32) {
    %c0_i32 = arith.constant 0 : i32
    %c0_i32_0 = arith.constant 0 : i32
    %c0_i32_1 = arith.constant 0 : i32
    return %arg0, %c0_i32, %c0_i32_0 : i32, i32, i32
  }
  func.func @transform_1(%arg0: i32) -> (i32, i32) {
    %c0_i32 = arith.constant 0 : i32
    %c0_i32_0 = arith.constant 0 : i32
    %c0_i32_1 = arith.constant 0 : i32
    return %c0_i32, %c0_i32_0 : i32, i32
  }
  func.func @transform_2(%arg0: i32) -> (i32, i32) {
    %c0_i32 = arith.constant 0 : i32
    %c0_i32_0 = arith.constant 0 : i32
    %c0_i32_1 = arith.constant 0 : i32
    return %c0_i32, %c0_i32_0 : i32, i32
  }
  func.func @transform_3(%arg0: i32) -> (i32, i32, i32) {
    %c0_i32 = arith.constant 0 : i32
    %c0_i32_0 = arith.constant 0 : i32
    %c0_i32_1 = arith.constant 0 : i32
    return %arg0, %c0_i32, %c0_i32_0 : i32, i32, i32
  }
}

</mosaic_0001>

<bundles_post_ra>
// kernel: tpu_custom_call.1
= control target key start
LH: loop header
LB: loop body
LE: loop exit
PB: predicated region body
PF: predicated region fallthrough
CT: control target
= control target key end

     0   :  { %8 = vsyncpa [#allocation3], 0  ;;  %s1285_s0 = inlined_call_operand.hbm [shape: f32[2,64,256], index: 0, kind: input, shape index: {}]   ;;  %s1286_s1 = inlined_call_operand.vmem [shape: f32[64,4], index: 1, kind: input, shape index: {}]   ;;  %s1287_s2 = inlined_call_operand.vmem [shape: f32[4,64], index: 2, kind: input, shape index: {}]   ;;  %s1288_s3 = inlined_call_operand.hbm [shape: f32[2,64,256], index: 3, kind: output, shape index: {}]  }
   0x1   :  { %10 = vsyncpa [#allocation3 + $0x1], 0 }
   0x2   :  { %11 = vsyncpa [#allocation4], 0 }
   0x3   :  { %13 = vsyncpa [#allocation4 + $0x1], 0  ;;  %s952_s12 = smov 0   ;;  %s954_s13 = smov 0  }
   0x4   :  { %s956_s14 = smov 0   ;;  %s958_s15 = smov 0  }
   0x5 LB: > { %s973_s16 = sadd.s32 4294967295, %s921_s15   ;;  %s701_s17 = sadd.s32 4294967294, %s921_s15   ;;  %s921_s15 = sphi %s958_s15, %s1301_s15   ;;  %s917_s14 = sphi %s956_s14, %s1300_s14   ;;  %s913_s13 = sphi %s954_s13, %s1299_s13   ;;  %s909_s12 = sphi %s952_s12, %s1298_s12  }
   0x6   : > { %s977_s18 = sadd.s32 1, %s921_s15   ;;  %s26_s19 = sadd.s32 1, %s917_s14 }
   0x7   : > { %s23_s20 = ssub.s32 %s921_s15, %s977_s18  ;;  %p33_p0 = scmp.ne.s32.totalorder %s917_s14, %s913_s13 }
   0x8   : > { %p24_p1 = scmp.eq.s32.totalorder %s23_s20, 0  ;;  %p34_p2 = scmp.eq.s32.totalorder %s921_s15, 0 }
   0x9   : > { %p39_p3 = scmp.ne.s32.totalorder %s913_s13, %s909_s12  ;;  %p40_p4 = scmp.eq.s32.totalorder %s973_s16, 0 }
   0xa   : > { %s989_s21 = scalar_select %p24_p1, %s917_s14, %s26_s19  }
   0xb   : > { %p991_p5 = por %p34_p2, %p33_p0  ;;  %p995_p6 = por %p40_p4, %p39_p3 }
   0xc   : > { %p105_p7 = scmp.eq.s32.totalorder %s973_s16, 1  ;;  %p111_p8 = scmp.eq.s32.totalorder %s701_s17, 1 }
   0xd   : > { %p780_p10 = scmp.lt.s32.totalorder %s921_s15, 2  ;;  %s137_s26 = sand.u32 1, %s917_s14  }
   0xe   : > { %p1002_p11 = por %p105_p7, %p33_p0  ;;  %p1006_p12 = por %p111_p8, %p39_p3 }
   0xf   : > { %s719_s27 = sshll.u32 %s921_s15, 11  ;;  %s704_s28 = sshll.u32 %s137_s26, 7 }
  0x10   : > { %s1292_s24 = scalar_select %p1002_p11, 1, 0 }
  0x11   : > { %s1293_s25 = scalar_select %p1006_p12, 1, 0 }
  0x12   : > { %s1015_s4 = scalar_lea.hbm %s1285_s0, %s719_s27  ;;  %s141_s5 = scalar_lea.vmem [#allocation2], %s704_s28 }
  0x13   : > { %s148_s6 = sshll.u32 %s141_s5, 4  ;;  %p1019_p13 = pnand %p780_p10, %p991_p5  ;;  %s1023_s6 = int_to_ptr.vmem [resolvable:$true] %s148_s6 }
  0x14   : > { %s1025_s8 = scalar_lea.sflag [#allocation3], %s137_s26  ;;  %s825_s9 = scalar_lea.hbm %s1015_s4, 2048 }
  0x15   : > { %p826_p0 = scmp.ne.s32.totalorder %s1015_s4, %s825_s9  ;;  %p827_p1 = pneg %p1019_p13 }
  0x16   : > { %s830_s17 = scalar_lea.hbm %s1285_s0, 4096  ;;  %p831_p4 = scmp.lt.u32.totalorder %s1015_s4, %s1285_s0 }
  0x17   : > { %p828_p2 = pnand %p827_p1, %p826_p0  ;;  %p832_p5 = scmp.lt.u32.totalorder %s830_s17, %s825_s9 }
  0x18   : > { %p834_p8 = scmp.lt.u32.totalorder %s825_s9, %s1015_s4 }
  0x19   : > { %p829_p3 = pneg %p828_p2  ;;  %p833_p7 = por %p832_p5, %p831_p4 }
  0x1b   : > { %p835_p10 = por %p834_p8, %p833_p7 }
  0x1d   : > { %p836_p9 = pnand %p835_p10, %p829_p3 }
  0x1f   : > { %839 = shalt.err (!%p836_p9)
}
  0x20   : > { %s840_s22 = scalar_lea.vmem %s1023_s6, 2048  ;;  %s923_s26 = smov [#allocation2]  }
  0x21   : > { %p841_p0 = scmp.ne.s32.totalorder %s1023_s6, %s840_s22  ;;  %s845_s27 = sshll.u32 %s923_s26, 4  ;;  %s846_s27 = int_to_ptr.vmem [resolvable:$false] %s845_s27 }
  0x22   : > { %s847_s28 = scalar_lea.vmem %s846_s27, 4096  ;;  %p848_p11 = scmp.lt.s32.totalorder %s1023_s6, %s846_s27 }
  0x23   : > { %p843_p2 = pnand %p841_p0, %p827_p1  ;;  %p849_p4 = scmp.lt.s32.totalorder %s847_s28, %s840_s22 }
  0x25   : > { %p844_p12 = pneg %p843_p2  ;;  %p850_p5 = por %p849_p4, %p848_p11 }
  0x27   : > { %p851_p7 = pnand %p850_p5, %p844_p12 }
  0x29   : > { %854 = shalt.err (!%p851_p7)
}
  0x2a   : > { %s924_s29 = smov 256   ;;  %s925_s30 = smov 16  }
  0x2b   : > { %775 = dma.hbm_to_vmem [thread:$0]  (!%p1019_p13), %s1015_s4, 2048, %s1023_s6, %s1025_s8, %s924_s29, %s924_s29, %s925_s30  }
  0x2c   : > { %p707_p9 = scmp.ge.s32.totalorder %s921_s15, 1  ;;  %p156_p1 = scmp.lt.s32.totalorder %s921_s15, 3 }
  0x2e   : > { %p157_p3 = pnand %p707_p9, %p156_p1 }
  0x2f   : > { %s1056_s5 = sand.u32 (!%p157_p3), 1, %s913_s13  }
  0x30   : > { %160 = sbr.rel (%p157_p3) target bundleno = 841 (0x349), region = 32  ;;  %s708_s9 = sshll.u32 (!%p157_p3), %s1056_s5, 7 }
  0x31   : > { %s163_s10 = scalar_lea.sflag (!%p157_p3), [#allocation3], %s1056_s5  ;;  %s1062_s11 = scalar_lea.vmem (!%p157_p3), [#allocation2], %s708_s9 }
  0x37   : > { %900 = dma.done.wait (%p995_p6), %s163_s10, 2048  }
  0x38   : > { %902 = vsyncadd (%p995_p6), %s163_s10, 4294965248  ;;  %v1069_v0 = vld [vmem:[%s1062_s11 + $0x20] sm:$0xff]  ;;  %v1072_v1 = vld [vmem:[%s1062_s11 + $0x28] sm:$0xff]  ;;  %v926_v35 = vmov 0.0|0.0   ;;  %vm927_vm0 = vmmov 0   ;;  %v928_v45 = vmov 0.0   ;;  %v278_v50 = vlaneseq }
  0x39   : > { %v1075_v2 = vld [vmem:[%s1062_s11] sm:$0xff]  ;;  %v235_v3 = vadd.f32 %v1072_v1, %v1069_v0  ;;  %v1080_v4 = vld [vmem:[%s1062_s11 + $0x8] sm:$0xff]  ;;  %v1083_v5 = vld [vmem:[%s1062_s11 + $0x10] sm:$0xff]  ;;  %v211_v17 = vmax.f32 %v1069_v0, %v1072_v1  ;;  %756 = vmatprep.subr.bf16.mxu0 %v926_v35  ;;  %748 = vmatprep.mubr.msk.f32.mxu0 %vm927_vm0, %v928_v45  ;;  %vm289_vm1 = vcmask 130112   ;;  %vm296_vm2 = vcmask 195712   ;;  %s1204_s6 = scalar_lea.vmem [#allocation5], %s708_s9 }
  0x3a   : > { %v1086_v6 = vld [vmem:[%s1062_s11 + $0x18] sm:$0xff]  ;;  %v229_v7 = vadd.f32 %v1080_v4, %v1075_v2  ;;  %v205_v8 = vmax.f32 %v1075_v2, %v1080_v4  ;;  %v1095_v10 = vld [vmem:[%s1062_s11 + $0x30] sm:$0xff]  ;;  %v1105_v14 = vld [vmem:[%s1062_s11 + $0x40] sm:$0xff]  ;;  %751 = vmatprep.subr.mxu1 %v928_v45  ;;  %753 = vmatprep.mubr.msk.f32.mxu1 %vm927_vm0, %v928_v45  ;;  %v279_v53 = vand.u32 127, %v278_v50  ;;  %v1172_v57 = vshrl.u32 %v278_v50, 7  ;;  %s720_s9 = sshll.u32 %s973_s16, 11 }
  0x3b   : > { %236 = vadd.xlane.f32.xlu1 %v235_v3  ;;  %v232_v9 = vadd.f32 %v1086_v6, %v1083_v5  ;;  %v1098_v11 = vld [vmem:[%s1062_s11 + $0x38] sm:$0xff]  ;;  %v208_v13 = vmax.f32 %v1083_v5, %v1086_v6  ;;  %v1108_v15 = vld [vmem:[%s1062_s11 + $0x48] sm:$0xff]  ;;  %v1115_v18 = vld [vmem:[%s1062_s11 + $0x50] sm:$0xff]  ;;  %vm303_vm3 = vcmask 261312   ;;  %vm310_vm4 = vcmask 326912   ;;  %s628_s7 = sshll.u32 %s1204_s6, 4  ;;  %s1235_s19 = scalar_lea.hbm %s1288_s3, %s720_s9  ;;  %s1237_s7 = int_to_ptr.vmem [resolvable:$true] %s628_s7 }
  0x3c   : > { %230 = vadd.xlane.f32.xlu0 %v229_v7  ;;  %v238_v12 = vadd.f32 %v1098_v11, %v1095_v10  ;;  %v241_v16 = vadd.f32 %v1108_v15, %v1105_v14  ;;  %v1118_v19 = vld [vmem:[%s1062_s11 + $0x58] sm:$0xff]  ;;  %v214_v21 = vmax.f32 %v1095_v10, %v1098_v11  ;;  %v1125_v22 = vld [vmem:[%s1062_s11 + $0x60] sm:$0xff]  ;;  %v1128_v23 = vld [vmem:[%s1062_s11 + $0x68] sm:$0xff]  ;;  %v217_v25 = vmax.f32 %v1105_v14, %v1108_v15  ;;  %s615_s16 = scalar_lea.sflag [#allocation4], %s1056_s5  ;;  %s855_s20 = scalar_lea.vmem %s1237_s7, 2048 }
  0x3d   : > { %v244_v20 = vadd.f32 %v1118_v19, %v1115_v18  ;;  %v247_v24 = vadd.f32 %v1128_v23, %v1125_v22  ;;  %v1135_v26 = vld [vmem:[%s1062_s11 + $0x70] sm:$0xff]  ;;  %v1138_v27 = vld [vmem:[%s1062_s11 + $0x78] sm:$0xff]  ;;  %v220_v29 = vmax.f32 %v1115_v18, %v1118_v19  ;;  %v223_v31 = vmax.f32 %v1125_v22, %v1128_v23  ;;  %v261_v32 = vld [vmem:[%s1286_s1] sm:$0xff]  ;;  %p856_p6 = scmp.ne.s32.totalorder %s1237_s7, %s855_s20  ;;  %p1295_p11 = scmp.ne.s32.totalorder %s1292_s24, 0 }
  0x3e   : > { %v250_v28 = vadd.f32 %v1138_v27, %v1135_v26  ;;  %v226_v30 = vmax.f32 %v1135_v26, %v1138_v27  ;;  %v262_v33 = vld [vmem:[%s1286_s1 + $0x8] sm:$0xff]  ;;  %v263_v36 = vld [vmem:[%s1286_s1 + $0x10] sm:$0xff]  ;;  %v264_v37 = vld [vmem:[%s1286_s1 + $0x18] sm:$0xff]  ;;  %v284_v55 = vadd.s32 4294967288, %v279_v53  ;;  %v291_v58 = vadd.s32 4294967280, %v279_v53  ;;  %s929_s22 = smov [#allocation5]  }
  0x3f   : > { %206 = vmax.xlane.f32.xlu1 %v205_v8  ;;  %v757_v34 = vpack.c.bf16 %v262_v33, %v261_v32  ;;  %v760_v38 = vpack.c.bf16 %v264_v37, %v263_v36  ;;  %v265_v39 = vld [vmem:[%s1286_s1 + $0x20] sm:$0xff]  ;;  %v266_v40 = vld [vmem:[%s1286_s1 + $0x28] sm:$0xff]  ;;  %v267_v42 = vld [vmem:[%s1286_s1 + $0x30] sm:$0xff]  ;;  %v298_v62 = vadd.s32 4294967272, %v279_v53  ;;  %v305_v3 = vadd.s32 4294967264, %v279_v53  ;;  %p857_p12 = pnand %p856_p6, %p1295_p11  ;;  %s859_s26 = sshll.u32 %s929_s22, 4  ;;  %s860_s26 = int_to_ptr.vmem [resolvable:$false] %s859_s26 }
  0x40   : > { %233 = vadd.xlane.f32.xlu0 %v232_v9  ;;  %v763_v41 = vpack.c.bf16 %v266_v40, %v265_v39  ;;  %v268_v43 = vld [vmem:[%s1286_s1 + $0x38] sm:$0xff]  ;;  %v287_v60 = vsub.s32 %v284_v55, %v1172_v57  ;;  %v312_v7 = vadd.s32 4294967256, %v279_v53  ;;  %v282_v8 = vsub.s32 %v279_v53, %v1172_v57  ;;  %s861_s27 = scalar_lea.vmem %s860_s26, 4096  ;;  %p862_p8 = scmp.lt.s32.totalorder %s1237_s7, %s860_s26 }
  0x41   : > { %758 = vmatpush3.bf16.msra.mxu0 %v757_v34  ;;  %v766_v44 = vpack.c.bf16 %v268_v43, %v267_v42  ;;  %vm317_vm5 = vcmask 392512   ;;  %vm324_vm6 = vcmask 458112   ;;  %vm331_vm7 = vcmask 523712   ;;  %p858_p13 = pneg %p857_p12  ;;  %p863_p10 = scmp.lt.s32.totalorder %s861_s27, %s855_s20 }
  0x42   : > { %759 = vmatprep.subr.bf16.mxu0 %v926_v35  ;;  %vm382_vm8 = vcmask 1040384   ;;  %vm384_vm9 = vcmask 523264   ;;  %vm467_vm10 = vcmask 1043456   ;;  %vm463_vm11 = vcmask 31744  }
  0x43   : > { %239 = vadd.xlane.f32.xlu1 %v238_v12  ;;  %v319_v12 = vadd.s32 4294967248, %v279_v53  ;;  %p864_p0 = por %p863_p10, %p862_p8 }
  0x44   : > { %209 = vmax.xlane.f32.xlu0 %v208_v13  ;;  %v294_v13 = vsub.s32 %v291_v58, %v1172_v57 }
  0x45   : > { %761 = vmatpush3.bf16.msra.mxu0 %v760_v38  ;;  %p865_p2 = pnand %p864_p0, %p858_p13 }
  0x46   : > { %762 = vmatprep.subr.bf16.mxu0 %v926_v35 }
  0x47   : > { %242 = vadd.xlane.f32.xlu1 %v241_v16 }
  0x48   : > { %212 = vmax.xlane.f32.xlu0 %v211_v17  ;;  %v326_v17 = vadd.s32 4294967240, %v279_v53 }
  0x49   : > { %764 = vmatpush3.bf16.msra.mxu0 %v763_v41 }
  0x4a   : > { %765 = vmatprep.subr.bf16.mxu0 %v926_v35  ;;  %v322_v35 = vsub.s32 %v319_v12, %v1172_v57  ;;  %v329_v39 = vsub.s32 %v326_v17, %v1172_v57 }
  0x4b   : > { %245 = vadd.xlane.f32.xlu1 %v244_v20 }
  0x4c   : > { %215 = vmax.xlane.f32.xlu0 %v214_v21  ;;  %v301_v21 = vsub.s32 %v298_v62, %v1172_v57 }
  0x4d   : > { %767 = vmatpush3.bf16.msra.mxu0 %v766_v44 }
  0x4f   : > { %248 = vadd.xlane.f32.xlu1 %v247_v24 }
  0x50   : > { %218 = vmax.xlane.f32.xlu0 %v217_v25 }
  0x53   : > { %251 = vadd.xlane.f32.xlu1 %v250_v28 }
  0x54   : > { %221 = vmax.xlane.f32.xlu0 %v220_v29  ;;  %v308_v29 = vsub.s32 %v305_v3, %v1172_v57 }
  0x57   : > { %227 = vmax.xlane.f32.xlu1 %v226_v30 }
  0x58   : > { %224 = vmax.xlane.f32.xlu0 %v223_v31  ;;  %v315_v31 = vsub.s32 %v312_v7, %v1172_v57 }
  0xc8   : > { %v237_v46 = vpop.xlane.xlu1 %236 }
  0xc9   : > { %v231_v47 = vpop.xlane.xlu0 %230  ;;  %v255_v28 = vmul.f32 0.00390625, %v237_v46 }
  0xca   : > { %v253_v9 = vmul.f32 0.00390625, %v231_v47 }
  0xcb   : > { %v354_v46 = vrot.slane %v255_v28, %v294_v13 }
  0xcc   : > { %v207_v48 = vpop.xlane.xlu1 %206  ;;  %v345_v32 = vrot.slane %v253_v9, %v282_v8 }
  0xcd   : > { %v234_v49 = vpop.xlane.xlu0 %233  ;;  %v283_v36 = vrot.slane %v207_v48, %v282_v8 }
  0xce   : > { %v254_v61 = vmul.f32 0.00390625, %v234_v49 }
  0xd0   : > { %v240_v51 = vpop.xlane.xlu1 %239  ;;  %v349_v20 = vrot.slane %v254_v61, %v287_v60 }
  0xd1   : > { %v210_v52 = vpop.xlane.xlu0 %209  ;;  %v256_v24 = vmul.f32 0.00390625, %v240_v51 }
  0xd2   : > { %v288_v33 = vrot.slane %v210_v52, %v287_v60  ;;  %v350_v41 = vsel %vm289_vm1, %v349_v20, %v345_v32  ;;  %v269_v20 = vld [vmem:[%s1287_s2] sm:$0xf] }
  0xd3   : > { %v359_v42 = vrot.slane %v256_v24, %v301_v21  ;;  %v355_v52 = vsel %vm296_vm2, %v354_v46, %v350_v41  ;;  %752 = vmatpush3.msk.msra.mxu1 %vm467_vm10, %v269_v20 }
  0xd4   : > { %v243_v54 = vpop.xlane.xlu1 %242  ;;  %v290_v50 = vsel %vm289_vm1, %v288_v33, %v283_v36 }
  0xd5   : > { %v213_v56 = vpop.xlane.xlu0 %212  ;;  %v257_v30 = vmul.f32 0.00390625, %v243_v54 }
  0xd6   : > { %v295_v37 = vrot.slane %v213_v56, %v294_v13  ;;  %v360_v56 = vsel %vm303_vm3, %v359_v42, %v355_v52 }
  0xd7   : > { %v364_v47 = vrot.slane %v257_v30, %v308_v29 }
  0xd8   : > { %v246_v59 = vpop.xlane.xlu1 %245  ;;  %v297_v53 = vsel %vm296_vm2, %v295_v37, %v290_v50 }
  0xd9   : > { %v216_v63 = vpop.xlane.xlu0 %215  ;;  %v258_v34 = vmul.f32 0.00390625, %v246_v59  ;;  %v365_v62 = vsel %vm310_vm4, %v364_v47, %v360_v56 }
  0xda   : > { %v302_v43 = vrot.slane %v216_v63, %v301_v21 }
  0xdb   : > { %v369_v51 = vrot.slane %v258_v34, %v315_v31 }
  0xdc   : > { %v249_v16 = vpop.xlane.xlu1 %248  ;;  %v304_v58 = vsel %vm303_vm3, %v302_v43, %v297_v53 }
  0xdd   : > { %v219_v25 = vpop.xlane.xlu0 %218  ;;  %v259_v38 = vmul.f32 0.00390625, %v249_v16  ;;  %v370_v7 = vsel %vm317_vm5, %v369_v51, %v365_v62 }
  0xde   : > { %v309_v49 = vrot.slane %v219_v25, %v308_v29 }
  0xdf   : > { %v374_v54 = vrot.slane %v259_v38, %v322_v35 }
  0xe0   : > { %v252_v40 = vpop.xlane.xlu1 %251  ;;  %v311_v63 = vsel %vm310_vm4, %v309_v49, %v304_v58 }
  0xe1   : > { %v222_v44 = vpop.xlane.xlu0 %221  ;;  %v260_v45 = vmul.f32 0.00390625, %v252_v40  ;;  %v375_v9 = vsel %vm324_vm6, %v374_v54, %v370_v7 }
  0xe2   : > { %v316_v48 = vrot.slane %v222_v44, %v315_v31 }
  0xe3   : > { %v379_v59 = vrot.slane %v260_v45, %v329_v39 }
  0xe4   : > { %v228_v55 = vpop.xlane.xlu1 %227  ;;  %v318_v8 = vsel %vm317_vm5, %v316_v48, %v311_v63 }
  0xe5   : > { %v225_v60 = vpop.xlane.xlu0 %224  ;;  %v330_v61 = vrot.slane %v228_v55, %v329_v39  ;;  %v380_v16 = vsel %vm331_vm7, %v379_v59, %v375_v9 }
  0xe6   : > { %v323_v3 = vrot.slane %v225_v60, %v322_v35  ;;  %v549_v35 = vsub.s32 0, %v1172_v57 }
  0xe8   : > { %v325_v12 = vsel %vm324_vm6, %v323_v3, %v318_v8 }
  0xe9   : > { %v332_v13 = vsel %vm331_vm7, %v330_v61, %v325_v12 }
  0xea   : > { %v383_v17 = vsel %vm382_vm8, %v332_v13, %v380_v16 }
  0xeb   : > { %749 = vmatmul.mubr.msk.f32.vlgmr.msra.gmra.mrb[0].mxu0 %vm384_vm9, %v383_v17 }
 0x1be   : > { %v454_v21 = vpop.f32.mrb[0].mxu0 }
 0x1bf   : > { %v458_v24 = vmax.f32 %v454_v21, 0.0  ;;  %v750_v25 = vpop.f32.mrb[1].mxu0 }
 0x1c1   : > { %v460_v28 = vrot.slane %v458_v24, 1 }
 0x1c3   : > { %v462_v29 = vadd.f32 %v460_v28, %v458_v24 }
 0x1c5   : > { %754 = vmatmul.mubr.msk.f32.vlgmr.msra.gmra.mrb[0].mxu1 %vm463_vm11, %v462_v29 }
 0x298   : > { %v537_v30 = vpop.f32.mrb[0].mxu1 }
 0x299   : > { %v713_v31 = vmul.f32 -1.442695, %v537_v30  ;;  %v755_v32 = vpop.f32.mrb[1].mxu1 }
 0x29b   : > { %821 = vpow2.f32 %v713_v31 }
 0x2a5   : > { %v822_v33 = vpop.eup %821 }
 0x2a6   : > { %v544_v34 = vadd.f32 1.0, %v822_v33 }
 0x2a8   : > { %823 = vrcp.f32 %v544_v34 }
 0x2b2   : > { %v824_v36 = vpop.eup %823 }
 0x2b3   : > { %v550_v37 = vrot.slane %v824_v36, %v549_v35 }
 0x2b5   : > { %556 = vbcast.lane.b32.xlu1 %v550_v37, 264  ;;  %552 = vbcast.lane.b32.xlu0 %v550_v37, 256 }
 0x2b9   : > { %560 = vbcast.lane.b32.xlu1 %v550_v37, 272  ;;  %568 = vbcast.lane.b32.xlu0 %v550_v37, 288 }
 0x2bd   : > { %564 = vbcast.lane.b32.xlu1 %v550_v37, 280  ;;  %576 = vbcast.lane.b32.xlu0 %v550_v37, 304 }
 0x2c1   : > { %572 = vbcast.lane.b32.xlu1 %v550_v37, 296 }
 0x2c5   : > { %580 = vbcast.lane.b32.xlu1 %v550_v37, 312 }
 0x327   : > { %v557_v38 = vpop.permute.xlu1 %556  ;;  %v553_v39 = vpop.permute.xlu0 %552 }
 0x328   : > { %v584_v40 = vmul.f32 %v557_v38, %v1083_v5  ;;  %v585_v41 = vmul.f32 %v557_v38, %v1086_v6  ;;  %v582_v42 = vmul.f32 %v553_v39, %v1075_v2  ;;  %v583_v57 = vmul.f32 %v553_v39, %v1080_v4 }
 0x32a   : > { %600 = vst [vmem:[%s1204_s6 + $0x10] sm:$0xff] %v584_v40  ;;  %601 = vst [vmem:[%s1204_s6 + $0x18] sm:$0xff] %v585_v41 }
 0x32b   : > { %598 = vst [vmem:[%s1204_s6] sm:$0xff] %v582_v42  ;;  %599 = vst [vmem:[%s1204_s6 + $0x8] sm:$0xff] %v583_v57  ;;  %v561_v5 = vpop.permute.xlu1 %560  ;;  %v569_v2 = vpop.permute.xlu0 %568 }
 0x32c   : > { %v586_v4 = vmul.f32 %v561_v5, %v1069_v0  ;;  %v587_v6 = vmul.f32 %v561_v5, %v1072_v1  ;;  %v590_v43 = vmul.f32 %v569_v2, %v1105_v14  ;;  %v591_v44 = vmul.f32 %v569_v2, %v1108_v15 }
 0x32e   : > { %602 = vst [vmem:[%s1204_s6 + $0x20] sm:$0xff] %v586_v4  ;;  %603 = vst [vmem:[%s1204_s6 + $0x28] sm:$0xff] %v587_v6 }
 0x32f   : > { %606 = vst [vmem:[%s1204_s6 + $0x40] sm:$0xff] %v590_v43  ;;  %607 = vst [vmem:[%s1204_s6 + $0x48] sm:$0xff] %v591_v44  ;;  %v565_v45 = vpop.permute.xlu1 %564  ;;  %v577_v46 = vpop.permute.xlu0 %576 }
 0x330   : > { %v588_v0 = vmul.f32 %v565_v45, %v1095_v10  ;;  %v589_v47 = vmul.f32 %v565_v45, %v1098_v11  ;;  %v594_v1 = vmul.f32 %v577_v46, %v1125_v22  ;;  %v595_v14 = vmul.f32 %v577_v46, %v1128_v23 }
 0x332   : > { %604 = vst [vmem:[%s1204_s6 + $0x30] sm:$0xff] %v588_v0  ;;  %605 = vst [vmem:[%s1204_s6 + $0x38] sm:$0xff] %v589_v47 }
 0x333   : > { %610 = vst [vmem:[%s1204_s6 + $0x60] sm:$0xff] %v594_v1  ;;  %611 = vst [vmem:[%s1204_s6 + $0x68] sm:$0xff] %v595_v14  ;;  %v573_v15 = vpop.permute.xlu1 %572 }
 0x334   : > { %v592_v49 = vmul.f32 %v573_v15, %v1115_v18  ;;  %v593_v50 = vmul.f32 %v573_v15, %v1118_v19 }
 0x336   : > { %608 = vst [vmem:[%s1204_s6 + $0x50] sm:$0xff] %v592_v49  ;;  %609 = vst [vmem:[%s1204_s6 + $0x58] sm:$0xff] %v593_v50 }
 0x337   : > { %v581_v10 = vpop.permute.xlu1 %580 }
 0x338   : > { %v596_v11 = vmul.f32 %v581_v10, %v1135_v26  ;;  %v597_v18 = vmul.f32 %v581_v10, %v1138_v27 }
 0x33a   : > { %612 = vst [vmem:[%s1204_s6 + $0x70] sm:$0xff] %v596_v11  ;;  %613 = vst [vmem:[%s1204_s6 + $0x78] sm:$0xff] %v597_v18 }
 0x33b   : > { %868 = shalt.err (!%p865_p2)
}
 0x33c   : > { %s869_s28 = scalar_lea.hbm %s1235_s19, 2048  ;;  %s873_s10 = scalar_lea.hbm %s1288_s3, 4096 }
 0x33d   : > { %p870_p4 = scmp.ne.s32.totalorder %s1235_s19, %s869_s28  ;;  %p874_p9 = scmp.lt.u32.totalorder %s1235_s19, %s1288_s3 }
 0x33e   : > { %p875_p1 = scmp.lt.u32.totalorder %s873_s10, %s869_s28  ;;  %p877_p6 = scmp.lt.u32.totalorder %s869_s28, %s1235_s19 }
 0x33f   : > { %p871_p5 = pnand %p870_p4, %p1295_p11 }
 0x340   : > { %p876_p3 = por %p875_p1, %p874_p9 }
 0x341   : > { %p872_p7 = pneg %p871_p5 }
 0x342   : > { %p878_p12 = por %p877_p6, %p876_p3 }
 0x344   : > { %p879_p13 = pnand %p878_p12, %p872_p7 }
 0x346   : > { %882 = shalt.err (!%p879_p13)
}
 0x347   : > { %s930_s4 = smov 256   ;;  %s931_s6 = smov 16  }
 0x348   : > { %770 = dma.vmem_to_hbm [thread:$0]  (%p1295_p11), %s1237_s7, 2048, %s1235_s19, %s615_s16, %s930_s4, %s930_s4, %s931_s6  }
 0x349 PF: > { %s643_s9 = sand.u32 1, %s909_s12   ;;  %p1296_p8 = scmp.ne.s32.totalorder %s1293_s25, 0 }
 0x34a   : > { %p1297_p10 = scmp.ge.s32.totalorder %s921_s15, 2  ;;  %s644_s8 = scalar_lea.sflag [#allocation4], %s643_s9 }
 0x34c   : > { %p777_p0 = pnand %p1297_p10, %p1296_p8 }
 0x34e   : > { %904 = dma.done.wait (!%p777_p0), %s644_s8, 2048  }
 0x34f   : > { %906 = vsyncadd (!%p777_p0), %s644_s8, 4294965248  ;;  %p16_p2 = scmp.ge.s32.totalorder %s977_s18, 4   ;;  %s1298_s12 = smov %s913_s13 }
 0x350   : > { %s1299_s13 = smov %s917_s14  ;;  %s1300_s14 = smov %s989_s21 }
 0x351   : > { %s1301_s15 = smov %s977_s18  ;;  %18 = sbr.rel (!%p16_p2) target bundleno = 5 (0x5), region = 77 }
 0x358   :  { %649 = vsyncpa [#allocation3], 1 }
 0x359   :  { %651 = vsyncpa [#allocation3 + $0x1], 1 }
 0x35a   :  { %652 = vsyncpa [#allocation4], 1 }
 0x35b   :  { %654 = vsyncpa [#allocation4 + $0x1], 1 }

</bundles_post_ra>
